<compile_context>
chip_gen: v7x
topology: tpu7x:2x2x1
jax: 0.10.0
libtpu: 0.0.40
codegen_flags: <defaults>
</compile_context>

<pallas_src>
import jax
import jax.numpy as jnp
from jax import lax
from jax.experimental import pallas as pl
from jax.experimental.pallas import tpu as pltpu  # noqa: F401  (imported per spec)

HIDDEN = 128
NUM_ACTIONS = 2
IN_DIM = 4           # CartPole observation dim (LazyLinear infers this from input)
IN_DIM_PAD = 8       # sublane-aligned contraction dim for the first matmul
OUT_PAD = 128        # lane-dense output slab width (>= NUM_ACTIONS)
_NEG_BIG = -1e30     # finite "-inf" for masking padded logit lanes

_SELU_ALPHA = 1.6732632423543772
_SELU_SCALE = 1.0507009873554805


def _selu(v):
    return _SELU_SCALE * jnp.where(v > 0, v, _SELU_ALPHA * (jnp.exp(v) - 1.0))


def policy_kernel(x_ref,
                  w1_ref, b1_ref,
                  w2_ref, b2_ref,
                  w3_ref, b3_ref,
                  wo_ref, bo_ref,
                  out_ref):
    x = x_ref[...]
    h = _selu(jnp.dot(x, w1_ref[...], preferred_element_type=jnp.float32) + b1_ref[...])
    h = _selu(jnp.dot(h, w2_ref[...], preferred_element_type=jnp.float32) + b2_ref[...])
    h = _selu(jnp.dot(h, w3_ref[...], preferred_element_type=jnp.float32) + b3_ref[...])
    # Final matmul against a lane-dense (HIDDEN, OUT_PAD) weight; padded columns are
    # zero and get masked before the softmax so the result is exact.
    logits = jnp.dot(h, wo_ref[...], preferred_element_type=jnp.float32) + bo_ref[...]
    lane = lax.broadcasted_iota(jnp.int32, logits.shape, 1)
    logits = jnp.where(lane < NUM_ACTIONS, logits, _NEG_BIG)
    m = jnp.max(logits, axis=-1, keepdims=True)
    e = jnp.exp(logits - m)
    # Unmasked lane-dense store of the full (B_pad, 128) softmax slab.
    out_ref[...] = e / jnp.sum(e, axis=-1, keepdims=True)


def _full_spec(shape):
    # Single-program kernel: every operand is one full VMEM block.
    return pl.BlockSpec(shape, lambda: tuple(0 for _ in shape))


def init_params(key, in_dim=IN_DIM, hidden=HIDDEN, num_actions=NUM_ACTIONS):
    """Deterministic init mimicking PyTorch nn.Linear default: U(-1/sqrt(fan_in), ...)."""
    dims = [(in_dim, hidden), (hidden, hidden), (hidden, hidden), (hidden, num_actions)]
    params = []
    for (fan_in, fan_out) in dims:
        key, kw, kb = jax.random.split(key, 3)
        bound = 1.0 / jnp.sqrt(float(fan_in))
        w = jax.random.uniform(kw, (fan_in, fan_out), jnp.float32, -bound, bound)
        b = jax.random.uniform(kb, (1, fan_out), jnp.float32, -bound, bound)
        params.append((w, b))
    return tuple(params)


def prepare_params(params):
    """One-time padding of params to TPU-friendly shapes (do this outside the RL loop)."""
    (w1, b1), (w2, b2), (w3, b3), (wo, bo) = params
    w1p = jnp.zeros((IN_DIM_PAD, HIDDEN), jnp.float32).at[:w1.shape[0], :].set(w1)
    wop = jnp.zeros((HIDDEN, OUT_PAD), jnp.float32).at[:, :wo.shape[1]].set(wo)
    bop = jnp.zeros((1, OUT_PAD), jnp.float32).at[:, :bo.shape[1]].set(bo)
    return ((w1p, b1), (w2, b2), (w3, b3), (wop, bop))


@jax.jit
def policy_forward(y, padded_params):
    """Pallas forward pass of PolicyNetwork. Accepts (D,) or (B, D) float32.

    For best throughput, batch many observations per call (B in the hundreds);
    at tiny B the call is launch/weight-DMA bound regardless of kernel quality.
    """
    batched_here = False
    if y.ndim == 1:
        batched_here = True
        y = y[None, :]
    B, D = y.shape

    # Pad batch to a sublane multiple and features to IN_DIM_PAD so all tiles
    # occupy full (8, 128) vreg fragments.
    B_pad = max(8, ((B + 7) // 8) * 8)
    x = jnp.zeros((B_pad, IN_DIM_PAD), jnp.float32)
    x = x.at[:B, :D].set(y.astype(jnp.float32))

    (w1, b1), (w2, b2), (w3, b3), (wo, bo) = padded_params

    out = pl.pallas_call(
        policy_kernel,
        out_shape=jax.ShapeDtypeStruct((B_pad, OUT_PAD), jnp.float32),
        grid=(),
        in_specs=[
            _full_spec(x.shape),
            _full_spec(w1.shape), _full_spec(b1.shape),
            _full_spec(w2.shape), _full_spec(b2.shape),
            _full_spec(w3.shape), _full_spec(b3.shape),
            _full_spec(wo.shape), _full_spec(bo.shape),
        ],
        out_specs=_full_spec((B_pad, OUT_PAD)),
    )(x, w1, b1, w2, b2, w3, b3, wo, bo)

    probs = out[:B, :NUM_ACTIONS]
    if batched_here:
        probs = probs[0]          # explicit leading-axis squeeze (avoids rank surprises)
    return probs


def _reference_forward(y, params):
    """Pure-JAX reference (unpadded params) for sanity checking."""
    batched_here = False
    if y.ndim == 1:
        batched_here = True
        y = y[None, :]
    (w1, b1), (w2, b2), (w3, b3), (wo, bo) = params
    h = _selu(y @ w1 + b1)
    h = _selu(h @ w2 + b2)
    h = _selu(h @ w3 + b3)
    out = jax.nn.softmax(h @ wo + bo, axis=-1)
    if batched_here:
        out = out[0]
    return out


if __name__ == "__main__":
    key = jax.random.PRNGKey(0)
    pkey, xkey, xkey2 = jax.random.split(key, 3)

    params = init_params(pkey)
    padded_params = prepare_params(params)   # one-time, outside the per-step loop

    # Small batched input consistent with CartPole observations: (B=2, D=4).
    x = jax.random.normal(xkey, (2, IN_DIM), dtype=jnp.float32)
    out = jax.block_until_ready(policy_forward(x, padded_params))
    ref = _reference_forward(x, params)
    assert out.shape == (2, NUM_ACTIONS)
    assert jnp.allclose(jnp.sum(out, axis=-1), 1.0, atol=1e-5)
    assert jnp.allclose(out, ref, atol=1e-5, rtol=1e-5)

    # Unbatched (1-D input) path.
    out1 = jax.block_until_ready(policy_forward(x[0], padded_params))
    assert out1.shape == (NUM_ACTIONS,)
    assert jnp.allclose(out1, ref[0], atol=1e-5, rtol=1e-5)

    # Non-multiple-of-8 batch to exercise the padding/slicing path.
    xb = jax.random.normal(xkey2, (13, IN_DIM), dtype=jnp.float32)
    outb = jax.block_until_ready(policy_forward(xb, padded_params))
    refb = _reference_forward(xb, params)
    assert outb.shape == (13, NUM_ACTIONS)
    assert jnp.allclose(outb, refb, atol=1e-5, rtol=1e-5)

    print("KERNEL_OK")
</pallas_src>

<mosaic_0001>
module attributes {stable_mosaic.version = 11 : i64} {
  func.func @policy_kernel(%arg0: memref<8x8xf32, #tpu.memory_space<vmem>>, %arg1: memref<8x128xf32, #tpu.memory_space<vmem>>, %arg2: memref<1x128xf32, #tpu.memory_space<vmem>>, %arg3: memref<128x128xf32, #tpu.memory_space<vmem>>, %arg4: memref<1x128xf32, #tpu.memory_space<vmem>>, %arg5: memref<128x128xf32, #tpu.memory_space<vmem>>, %arg6: memref<1x128xf32, #tpu.memory_space<vmem>>, %arg7: memref<128x128xf32, #tpu.memory_space<vmem>>, %arg8: memref<1x128xf32, #tpu.memory_space<vmem>>, %arg9: memref<8x128xf32, #tpu.memory_space<vmem>>) attributes {dimension_semantics = [], scalar_prefetch = 0 : i64, scratch_operands = 0 : i64, tpu.core_type = #tpu.core_type<tc>} {
    %c0 = arith.constant 0 : index
    %c0_0 = arith.constant 0 : index
    %0 = vector.load %arg0[%c0, %c0_0] : memref<8x8xf32, #tpu.memory_space<vmem>>, vector<8x8xf32>
    %c0_1 = arith.constant 0 : index
    %c0_2 = arith.constant 0 : index
    %1 = vector.load %arg1[%c0_1, %c0_2] : memref<8x128xf32, #tpu.memory_space<vmem>>, vector<8x128xf32>
    %cst = arith.constant dense<0.000000e+00> : vector<8x128xf32>
    %2 = tpu.matmul %0, %1, %cst {dimension_numbers = #tpu.dot_dimension_numbers<[1], [0], [0], [1], [0, 0, 1, 1], [], []>} : vector<8x8xf32>, vector<8x128xf32>, vector<8x128xf32> -> vector<8x128xf32>
    %c0_3 = arith.constant 0 : index
    %c0_4 = arith.constant 0 : index
    %3 = vector.load %arg2[%c0_3, %c0_4] : memref<1x128xf32, #tpu.memory_space<vmem>>, vector<1x128xf32>
    %4 = vector.broadcast %3 : vector<1x128xf32> to vector<8x128xf32>
    %5 = arith.addf %2, %4 : vector<8x128xf32>
    %cst_5 = arith.constant 0.000000e+00 : f32
    %6 = vector.broadcast %cst_5 : f32 to vector<8x128xf32>
    %7 = arith.cmpf ogt, %5, %6 : vector<8x128xf32>
    %8 = math.exp %5 : vector<8x128xf32>
    %cst_6 = arith.constant 1.000000e+00 : f32
    %9 = vector.broadcast %cst_6 : f32 to vector<8x128xf32>
    %10 = arith.subf %8, %9 : vector<8x128xf32>
    %cst_7 = arith.constant 1.67326319 : f32
    %11 = vector.broadcast %cst_7 : f32 to vector<8x128xf32>
    %12 = arith.mulf %11, %10 : vector<8x128xf32>
    %13 = arith.select %7, %5, %12 : vector<8x128xi1>, vector<8x128xf32>
    %cst_8 = arith.constant 1.05070102 : f32
    %14 = vector.broadcast %cst_8 : f32 to vector<8x128xf32>
    %15 = arith.mulf %14, %13 : vector<8x128xf32>
    %c0_9 = arith.constant 0 : index
    %c0_10 = arith.constant 0 : index
    %16 = vector.load %arg3[%c0_9, %c0_10] : memref<128x128xf32, #tpu.memory_space<vmem>>, vector<128x128xf32>
    %cst_11 = arith.constant dense<0.000000e+00> : vector<8x128xf32>
    %17 = tpu.matmul %15, %16, %cst_11 {dimension_numbers = #tpu.dot_dimension_numbers<[1], [0], [0], [1], [0, 0, 1, 1], [], []>} : vector<8x128xf32>, vector<128x128xf32>, vector<8x128xf32> -> vector<8x128xf32>
    %c0_12 = arith.constant 0 : index
    %c0_13 = arith.constant 0 : index
    %18 = vector.load %arg4[%c0_12, %c0_13] : memref<1x128xf32, #tpu.memory_space<vmem>>, vector<1x128xf32>
    %19 = vector.broadcast %18 : vector<1x128xf32> to vector<8x128xf32>
    %20 = arith.addf %17, %19 : vector<8x128xf32>
    %cst_14 = arith.constant 0.000000e+00 : f32
    %21 = vector.broadcast %cst_14 : f32 to vector<8x128xf32>
    %22 = arith.cmpf ogt, %20, %21 : vector<8x128xf32>
    %23 = math.exp %20 : vector<8x128xf32>
    %cst_15 = arith.constant 1.000000e+00 : f32
    %24 = vector.broadcast %cst_15 : f32 to vector<8x128xf32>
    %25 = arith.subf %23, %24 : vector<8x128xf32>
    %cst_16 = arith.constant 1.67326319 : f32
    %26 = vector.broadcast %cst_16 : f32 to vector<8x128xf32>
    %27 = arith.mulf %26, %25 : vector<8x128xf32>
    %28 = arith.select %22, %20, %27 : vector<8x128xi1>, vector<8x128xf32>
    %cst_17 = arith.constant 1.05070102 : f32
    %29 = vector.broadcast %cst_17 : f32 to vector<8x128xf32>
    %30 = arith.mulf %29, %28 : vector<8x128xf32>
    %c0_18 = arith.constant 0 : index
    %c0_19 = arith.constant 0 : index
    %31 = vector.load %arg5[%c0_18, %c0_19] : memref<128x128xf32, #tpu.memory_space<vmem>>, vector<128x128xf32>
    %cst_20 = arith.constant dense<0.000000e+00> : vector<8x128xf32>
    %32 = tpu.matmul %30, %31, %cst_20 {dimension_numbers = #tpu.dot_dimension_numbers<[1], [0], [0], [1], [0, 0, 1, 1], [], []>} : vector<8x128xf32>, vector<128x128xf32>, vector<8x128xf32> -> vector<8x128xf32>
    %c0_21 = arith.constant 0 : index
    %c0_22 = arith.constant 0 : index
    %33 = vector.load %arg6[%c0_21, %c0_22] : memref<1x128xf32, #tpu.memory_space<vmem>>, vector<1x128xf32>
    %34 = vector.broadcast %33 : vector<1x128xf32> to vector<8x128xf32>
    %35 = arith.addf %32, %34 : vector<8x128xf32>
    %cst_23 = arith.constant 0.000000e+00 : f32
    %36 = vector.broadcast %cst_23 : f32 to vector<8x128xf32>
    %37 = arith.cmpf ogt, %35, %36 : vector<8x128xf32>
    %38 = math.exp %35 : vector<8x128xf32>
    %cst_24 = arith.constant 1.000000e+00 : f32
    %39 = vector.broadcast %cst_24 : f32 to vector<8x128xf32>
    %40 = arith.subf %38, %39 : vector<8x128xf32>
    %cst_25 = arith.constant 1.67326319 : f32
    %41 = vector.broadcast %cst_25 : f32 to vector<8x128xf32>
    %42 = arith.mulf %41, %40 : vector<8x128xf32>
    %43 = arith.select %37, %35, %42 : vector<8x128xi1>, vector<8x128xf32>
    %cst_26 = arith.constant 1.05070102 : f32
    %44 = vector.broadcast %cst_26 : f32 to vector<8x128xf32>
    %45 = arith.mulf %44, %43 : vector<8x128xf32>
    %c0_27 = arith.constant 0 : index
    %c0_28 = arith.constant 0 : index
    %46 = vector.load %arg7[%c0_27, %c0_28] : memref<128x128xf32, #tpu.memory_space<vmem>>, vector<128x128xf32>
    %cst_29 = arith.constant dense<0.000000e+00> : vector<8x128xf32>
    %47 = tpu.matmul %45, %46, %cst_29 {dimension_numbers = #tpu.dot_dimension_numbers<[1], [0], [0], [1], [0, 0, 1, 1], [], []>} : vector<8x128xf32>, vector<128x128xf32>, vector<8x128xf32> -> vector<8x128xf32>
    %c0_30 = arith.constant 0 : index
    %c0_31 = arith.constant 0 : index
    %48 = vector.load %arg8[%c0_30, %c0_31] : memref<1x128xf32, #tpu.memory_space<vmem>>, vector<1x128xf32>
    %49 = vector.broadcast %48 : vector<1x128xf32> to vector<8x128xf32>
    %50 = arith.addf %47, %49 : vector<8x128xf32>
    %51 = tpu.iota {dimensions = array<i32: 1>} : vector<8x128xi32>
    %c2_i32 = arith.constant 2 : i32
    %52 = vector.broadcast %c2_i32 : i32 to vector<8x128xi32>
    %53 = arith.cmpi slt, %51, %52 : vector<8x128xi32>
    %cst_32 = arith.constant -1.000000e+30 : f32
    %54 = vector.broadcast %cst_32 : f32 to vector<8x128xf32>
    %55 = arith.select %53, %50, %54 : vector<8x128xi1>, vector<8x128xf32>
    %cst_33 = arith.constant dense<0xFF800000> : vector<8xf32>
    %56 = vector.multi_reduction <maximumf>, %55, %cst_33 [1] : vector<8x128xf32> to vector<8xf32>
    %57 = vector.shape_cast %56 : vector<8xf32> to vector<8x1xf32>
    %58 = vector.broadcast %57 : vector<8x1xf32> to vector<8x128xf32>
    %59 = arith.subf %55, %58 : vector<8x128xf32>
    %60 = math.exp %59 : vector<8x128xf32>
    %cst_34 = arith.constant dense<0.000000e+00> : vector<8xf32>
    %61 = vector.multi_reduction <add>, %60, %cst_34 [1] : vector<8x128xf32> to vector<8xf32>
    %62 = vector.shape_cast %61 : vector<8xf32> to vector<8x1xf32>
    %63 = vector.broadcast %62 : vector<8x1xf32> to vector<8x128xf32>
    %64 = arith.divf %60, %63 : vector<8x128xf32>
    %c0_35 = arith.constant 0 : index
    %c0_36 = arith.constant 0 : index
    %65 = vector.load %arg9[%c0_35, %c0_36] : memref<8x128xf32, #tpu.memory_space<vmem>>, vector<8x128xf32>
    tpu.vector_store %arg9[%c0_35, %c0_36], %64 {strides = array<i32>} : memref<8x128xf32, #tpu.memory_space<vmem>>, vector<8x128xf32>,
    return
  }
}

</mosaic_0001>

<bundles_post_ra>
// kernel: policy_forward.1
= control target key start
LH: loop header
LB: loop body
LE: loop exit
PB: predicated region body
PF: predicated region fallthrough
CT: control target
= control target key end

     0   :  { %14 = vsyncpa [#allocation3], 0  ;;  %s971_s0 = inlined_call_operand.vmem [shape: f32[8,8], index: 0, kind: input, shape index: {}]   ;;  %s972_s1 = inlined_call_operand.vmem [shape: f32[8,128], index: 1, kind: input, shape index: {}]   ;;  %s973_s2 = inlined_call_operand.vmem [shape: f32[1,128], index: 2, kind: input, shape index: {}]   ;;  %s974_s3 = inlined_call_operand.hbm [shape: f32[128,128], index: 3, kind: input, shape index: {}]   ;;  %s975_s4 = inlined_call_operand.vmem [shape: f32[1,128], index: 4, kind: input, shape index: {}]   ;;  %s976_s5 = inlined_call_operand.hbm [shape: f32[128,128], index: 5, kind: input, shape index: {}]   ;;  %s977_s6 = inlined_call_operand.vmem [shape: f32[1,128], index: 6, kind: input, shape index: {}]   ;;  %s978_s7 = inlined_call_operand.hbm [shape: f32[128,128], index: 7, kind: input, shape index: {}]   ;;  %s979_s8 = inlined_call_operand.vmem [shape: f32[1,128], index: 8, kind: input, shape index: {}]   ;;  %s980_s9 = inlined_call_operand.vmem [shape: f32[8,128], index: 9, kind: output, shape index: {}]  }
   0x1   :  { %15 = vsyncpa [#allocation5], 0  ;;  %s807_s30 = smov [#allocation4]   ;;  %s808_s11 = smov [#allocation2]  }
   0x2   :  { %s41_s10 = sshll.u32 %s807_s30, 4  ;;  %s27_s12 = sshll.u32 %s808_s11, 4  ;;  %s42_s10 = int_to_ptr.vmem [resolvable:$true] %s41_s10  ;;  %s865_s12 = int_to_ptr.vmem [resolvable:$true] %s27_s12 }
   0x3   :  { %s737_s15 = scalar_lea.hbm %s976_s5, 2048 }
   0x4   :  { %p738_p0 = scmp.ne.s32.totalorder %s976_s5, %s737_s15  ;;  %p741_p1 = scmp.lt.u32.totalorder %s737_s15, %s976_s5 }
   0x6   :  { %p743_p2 = pnand %p741_p1, %p738_p0 }
   0x8   :  { %746 = shalt.err (!%p743_p2)
}
   0x9   :  { %s747_s20 = scalar_lea.vmem %s42_s10, 2048  ;;  %p752_p4 = scmp.lt.s32.totalorder %s42_s10, %s42_s10 }
   0xa   :  { %p748_p3 = scmp.ne.s32.totalorder %s42_s10, %s747_s20  ;;  %p753_p5 = scmp.lt.s32.totalorder %s747_s20, %s747_s20 }
   0xc   :  { %p754_p6 = por %p753_p5, %p752_p4 }
   0xe   :  { %p755_p7 = pnand %p754_p6, %p748_p3 }
  0x10   :  { %758 = shalt.err (!%p755_p7)
}
  0x11   :  { %s809_s21 = smov 128   ;;  %s810_s22 = smov 8  }
  0x12   :  { %47 = dma.hbm_to_vmem [thread:$0]  %s976_s5, 2048, %s42_s10, [#allocation5], %s809_s21, %s809_s21, %s810_s22  }
  0x13   :  { %s759_s27 = scalar_lea.hbm %s974_s3, 2048 }
  0x14   :  { %p760_p8 = scmp.ne.s32.totalorder %s974_s3, %s759_s27  ;;  %p763_p9 = scmp.lt.u32.totalorder %s759_s27, %s974_s3 }
  0x16   :  { %p765_p10 = pnand %p763_p9, %p760_p8 }
  0x18   :  { %768 = shalt.err (!%p765_p10)
}
  0x19   :  { %s769_s13 = scalar_lea.vmem %s865_s12, 2048  ;;  %p774_p12 = scmp.lt.s32.totalorder %s865_s12, %s865_s12 }
  0x1a   :  { %p770_p11 = scmp.ne.s32.totalorder %s865_s12, %s769_s13  ;;  %p775_p13 = scmp.lt.s32.totalorder %s769_s13, %s769_s13 }
  0x1c   :  { %p776_p0 = por %p775_p13, %p774_p12 }
  0x1e   :  { %p777_p1 = pnand %p776_p0, %p770_p11 }
  0x20   :  { %780 = shalt.err (!%p777_p1)
}
  0x21   :  { %33 = dma.hbm_to_vmem [thread:$0]  %s974_s3, 2048, %s865_s12, [#allocation3], %s809_s21, %s809_s21, %s810_s22  }
  0x22   :  { %s811_s14 = smov [#allocation6]   ;;  %s781_s18 = scalar_lea.hbm %s978_s7, 2048 }
  0x23   :  { %s55_s15 = sshll.u32 %s811_s14, 4  ;;  %p782_p2 = scmp.ne.s32.totalorder %s978_s7, %s781_s18  ;;  %s56_s15 = int_to_ptr.vmem [resolvable:$true] %s55_s15 }
  0x24   :  { %p785_p3 = scmp.lt.u32.totalorder %s781_s18, %s978_s7 }
  0x26   :  { %p787_p4 = pnand %p785_p3, %p782_p2 }
  0x28   :  { %790 = shalt.err (!%p787_p4)
}
  0x29   :  { %s791_s25 = scalar_lea.vmem %s56_s15, 2048  ;;  %p796_p6 = scmp.lt.s32.totalorder %s56_s15, %s56_s15 }
  0x2a   :  { %p792_p5 = scmp.ne.s32.totalorder %s56_s15, %s791_s25  ;;  %p797_p7 = scmp.lt.s32.totalorder %s791_s25, %s791_s25 }
  0x2c   :  { %p798_p8 = por %p797_p7, %p796_p6 }
  0x2e   :  { %p799_p9 = pnand %p798_p8, %p792_p5 }
  0x30   :  { %802 = shalt.err (!%p799_p9)
}
  0x31   :  { %61 = dma.hbm_to_vmem [thread:$0]  %s978_s7, 2048, %s56_s15, [#allocation5], %s809_s21, %s809_s21, %s810_s22  }
  0x32   :  { %803 = dma.done.wait [#allocation3], 2048  }
  0x33   :  { %804 = vsyncadd [#allocation3], 4294965248 }
  0x34   :  { %805 = dma.done.wait [#allocation5], 4096  }
  0x35   :  { %806 = vsyncadd [#allocation5], 4294963200  ;;  %v812_v0 = vmov 0.0   ;;  %vm813_vm0 = vmmov 0   ;;  %v814_v1 = vmov 0.0|0.0   ;;  %vm82_vm1 = vcmask 64512  }
  0x36   :  { %537 = vmatprep.subr.mxu0 %v812_v0  ;;  %539 = vmatprep.mubr.msk.f32.mxu0 %vm813_vm0, %v812_v0  ;;  %v74_v2 = vld [vmem:[%s972_s1] sm:$0xff]  ;;  %v164_v5 = vld [vmem:[#allocation2 + $0x8] sm:$0xff]  ;;  %v165_v6 = vld [vmem:[#allocation2 + $0x10] sm:$0xff] }
  0x37   :  { %647 = vmatprep.subr.bf16.mxu1 %v814_v1  ;;  %574 = vmatprep.mubr.msk.f32.mxu1 %vm813_vm0, %v812_v0  ;;  %v73_v3 = vld [vmem:[%s971_s0] sm:$0xff]  ;;  %v166_v7 = vld [vmem:[#allocation2 + $0x18] sm:$0xff]  ;;  %v168_v11 = vld [vmem:[#allocation2 + $0x28] sm:$0xff] }
  0x38   :  { %v163_v4 = vld [vmem:[#allocation2] sm:$0xff]  ;;  %538 = vmatpush3.msra.mxu0 %v74_v2  ;;  %v651_v9 = vpack.c.bf16 %v166_v7, %v165_v6  ;;  %v169_v13 = vld [vmem:[#allocation2 + $0x30] sm:$0xff]  ;;  %v170_v14 = vld [vmem:[#allocation2 + $0x38] sm:$0xff] }
  0x39   :  { %540 = vmatmul.mubr.msk.f32.vlgmr.msra.gmra.mrb[0].mxu0 %vm82_vm1, %v73_v3  ;;  %v648_v8 = vpack.c.bf16 %v164_v5, %v163_v4  ;;  %671 = vmatprep.subr.bf16.mxu0 %v814_v1  ;;  %v167_v10 = vld [vmem:[#allocation2 + $0x20] sm:$0xff]  ;;  %v657_v15 = vpack.c.bf16 %v170_v14, %v169_v13  ;;  %v172_v17 = vld [vmem:[#allocation2 + $0x48] sm:$0xff]  ;;  %v173_v19 = vld [vmem:[#allocation2 + $0x50] sm:$0xff] }
  0x3a   :  { %609 = vmatprep.mubr.msk.f32.mxu0 %vm813_vm0, %v812_v0  ;;  %v654_v12 = vpack.c.bf16 %v168_v11, %v167_v10  ;;  %v171_v16 = vld [vmem:[#allocation2 + $0x40] sm:$0xff]  ;;  %v174_v20 = vld [vmem:[#allocation2 + $0x58] sm:$0xff]  ;;  %v176_v23 = vld [vmem:[#allocation2 + $0x68] sm:$0xff] }
  0x3b   :  { %649 = vmatpush3.bf16.msra.mxu1 %v648_v8  ;;  %v660_v18 = vpack.c.bf16 %v172_v17, %v171_v16  ;;  %v663_v21 = vpack.c.bf16 %v174_v20, %v173_v19  ;;  %v175_v22 = vld [vmem:[#allocation2 + $0x60] sm:$0xff]  ;;  %v177_v25 = vld [vmem:[#allocation2 + $0x70] sm:$0xff]  ;;  %v178_v26 = vld [vmem:[#allocation2 + $0x78] sm:$0xff] }
  0x3c   :  { %650 = vmatprep.subr.bf16.mxu1 %v814_v1  ;;  %v666_v24 = vpack.c.bf16 %v176_v23, %v175_v22  ;;  %v669_v27 = vpack.c.bf16 %v178_v26, %v177_v25  ;;  %v263_v28 = vld [vmem:[#allocation4] sm:$0xff]  ;;  %v264_v29 = vld [vmem:[#allocation4 + $0x8] sm:$0xff]  ;;  %v265_v30 = vld [vmem:[#allocation4 + $0x10] sm:$0xff] }
  0x3d   :  { %v672_v31 = vpack.c.bf16 %v264_v29, %v263_v28  ;;  %v266_v32 = vld [vmem:[#allocation4 + $0x18] sm:$0xff]  ;;  %v476_v34 = vld [vmem:[%s973_s2] ss:$0 sm:$0xff]  ;;  %v268_v45 = vld [vmem:[#allocation4 + $0x28] sm:$0xff] }
  0x3e   :  { %v675_v33 = vpack.c.bf16 %v266_v32, %v265_v30  ;;  %v267_v44 = vld [vmem:[#allocation4 + $0x20] sm:$0xff]  ;;  %v269_v47 = vld [vmem:[#allocation4 + $0x30] sm:$0xff]  ;;  %v270_v48 = vld [vmem:[#allocation4 + $0x38] sm:$0xff] }
  0x3f   :  { %652 = vmatpush3.bf16.msra.mxu1 %v651_v9  ;;  %673 = vmatpush3.bf16.msra.mxu0 %v672_v31  ;;  %v678_v46 = vpack.c.bf16 %v268_v45, %v267_v44  ;;  %v681_v49 = vpack.c.bf16 %v270_v48, %v269_v47  ;;  %v271_v50 = vld [vmem:[#allocation4 + $0x40] sm:$0xff]  ;;  %v272_v51 = vld [vmem:[#allocation4 + $0x48] sm:$0xff]  ;;  %v273_v53 = vld [vmem:[#allocation4 + $0x50] sm:$0xff] }
  0x40   :  { %653 = vmatprep.subr.bf16.mxu1 %v814_v1  ;;  %674 = vmatprep.subr.bf16.mxu0 %v814_v1  ;;  %v684_v52 = vpack.c.bf16 %v272_v51, %v271_v50  ;;  %v274_v54 = vld [vmem:[#allocation4 + $0x58] sm:$0xff]  ;;  %v275_v56 = vld [vmem:[#allocation4 + $0x60] sm:$0xff]  ;;  %v276_v57 = vld [vmem:[#allocation4 + $0x68] sm:$0xff] }
  0x41   :  { %v687_v55 = vpack.c.bf16 %v274_v54, %v273_v53  ;;  %v690_v58 = vpack.c.bf16 %v276_v57, %v275_v56  ;;  %v277_v59 = vld [vmem:[#allocation4 + $0x70] sm:$0xff]  ;;  %v278_v60 = vld [vmem:[#allocation4 + $0x78] sm:$0xff]  ;;  %v363_v62 = vld [vmem:[#allocation6] sm:$0xff] }
  0x42   :  { %v693_v61 = vpack.c.bf16 %v278_v60, %v277_v59  ;;  %v364_v63 = vld [vmem:[#allocation6 + $0x8] sm:$0xff]  ;;  %v366_v3 = vld [vmem:[#allocation6 + $0x18] sm:$0xff]  ;;  %v479_v5 = vld [vmem:[%s975_s4] ss:$0 sm:$0xff] }
  0x43   :  { %655 = vmatpush3.bf16.msra.mxu1 %v654_v12  ;;  %676 = vmatpush3.bf16.msra.mxu0 %v675_v33  ;;  %v696_v2 = vpack.c.bf16 %v364_v63, %v363_v62  ;;  %v368_v16 = vld [vmem:[#allocation6 + $0x28] sm:$0xff]  ;;  %v370_v19 = vld [vmem:[#allocation6 + $0x38] sm:$0xff]  ;;  %v377_v30 = vld [vmem:[#allocation6 + $0x70] sm:$0xff] }
  0x44   :  { %656 = vmatprep.subr.bf16.mxu1 %v814_v1  ;;  %677 = vmatprep.subr.bf16.mxu0 %v814_v1  ;;  %v372_v22 = vld [vmem:[#allocation6 + $0x48] sm:$0xff]  ;;  %v374_v25 = vld [vmem:[#allocation6 + $0x58] sm:$0xff]  ;;  %v481_v33 = vld [vmem:[%s977_s6] ss:$0 sm:$0xff] }
  0x45   :  { %v376_v28 = vld [vmem:[#allocation6 + $0x68] sm:$0xff]  ;;  %v378_v31 = vld [vmem:[#allocation6 + $0x78] sm:$0xff]  ;;  %v483_v44 = vld [vmem:[%s979_s8] ss:$0 sm:$0xff] }
  0x46   :  { %v717_v32 = vpack.c.bf16 %v378_v31, %v377_v30 }
  0x47   :  { %658 = vmatpush3.bf16.msra.mxu1 %v657_v15  ;;  %679 = vmatpush3.bf16.msra.mxu0 %v678_v46  ;;  %v367_v15 = vld [vmem:[#allocation6 + $0x20] sm:$0xff] }
  0x48   :  { %659 = vmatprep.subr.bf16.mxu1 %v814_v1  ;;  %680 = vmatprep.subr.bf16.mxu0 %v814_v1  ;;  %v702_v17 = vpack.c.bf16 %v368_v16, %v367_v15 }
  0x4b   :  { %661 = vmatpush3.bf16.msra.mxu1 %v660_v18  ;;  %682 = vmatpush3.bf16.msra.mxu0 %v681_v49  ;;  %v369_v18 = vld [vmem:[#allocation6 + $0x30] sm:$0xff] }
  0x4c   :  { %662 = vmatprep.subr.bf16.mxu1 %v814_v1  ;;  %683 = vmatprep.subr.bf16.mxu0 %v814_v1  ;;  %v705_v20 = vpack.c.bf16 %v370_v19, %v369_v18 }
  0x4f   :  { %664 = vmatpush3.bf16.msra.mxu1 %v663_v21  ;;  %685 = vmatpush3.bf16.msra.mxu0 %v684_v52  ;;  %v371_v21 = vld [vmem:[#allocation6 + $0x40] sm:$0xff] }
  0x50   :  { %665 = vmatprep.subr.bf16.mxu1 %v814_v1  ;;  %686 = vmatprep.subr.bf16.mxu0 %v814_v1  ;;  %v708_v23 = vpack.c.bf16 %v372_v22, %v371_v21 }
  0x53   :  { %667 = vmatpush3.bf16.msra.mxu1 %v666_v24  ;;  %688 = vmatpush3.bf16.msra.mxu0 %v687_v55  ;;  %v373_v24 = vld [vmem:[#allocation6 + $0x50] sm:$0xff] }
  0x54   :  { %668 = vmatprep.subr.bf16.mxu1 %v814_v1  ;;  %689 = vmatprep.subr.bf16.mxu0 %v814_v1  ;;  %v711_v26 = vpack.c.bf16 %v374_v25, %v373_v24 }
  0x57   :  { %670 = vmatpush3.bf16.msra.mxu1 %v669_v27  ;;  %691 = vmatpush3.bf16.msra.mxu0 %v690_v58  ;;  %v375_v27 = vld [vmem:[#allocation6 + $0x60] sm:$0xff] }
  0x58   :  { %695 = vmatprep.subr.bf16.mxu1 %v814_v1  ;;  %692 = vmatprep.subr.bf16.mxu0 %v814_v1  ;;  %v714_v29 = vpack.c.bf16 %v376_v28, %v375_v27 }
  0x5b   :  { %694 = vmatpush3.bf16.msra.mxu0 %v693_v61 }
 0x10c   :  { %v152_v35 = vpop.f32.mrb[0].mxu0 }
 0x10d   :  { %v153_v36 = vadd.f32 %v476_v34, %v152_v35  ;;  %v541_v37 = vpop.f32.mrb[1].mxu0 }
 0x10f   :  { %v157_v38 = vmul.f32 1.442695, %v153_v36  ;;  %vm156_vm2 = vcmp.gt.f32.partialorder %v153_v36, 0.0 }
 0x111   :  { %727 = vpow2.f32 %v157_v38 }
 0x11b   :  { %v728_v39 = vpop.eup %727 }
 0x11c   :  { %v478_v40 = vadd.f32 -1.0, %v728_v39 }
 0x11e   :  { %v160_v41 = vmul.f32 1.6732632, %v478_v40 }
 0x120   :  { %v161_v42 = vsel %vm156_vm2, %v153_v36, %v160_v41 }
 0x121   :  { %v162_v43 = vmul.f32 1.050701, %v161_v42 }
 0x123   :  { %575 = vmatmul.mubr.f32.vlgmr.msra.gmra.mrb[0].mxu1 %v162_v43 }
 0x124   :  { %644 = vmatprep.mubr.msk.f32.mxu1 %vm813_vm0, %v812_v0  ;;  %v365_v0 = vld [vmem:[#allocation6 + $0x10] sm:$0xff]  ;;  %697 = vmatpush3.bf16.msra.mxu1 %v696_v2 }
 0x125   :  { %v699_v4 = vpack.c.bf16 %v366_v3, %v365_v0  ;;  %698 = vmatprep.subr.bf16.mxu1 %v814_v1 }
 0x128   :  { %700 = vmatpush3.bf16.msra.mxu1 %v699_v4 }
 0x129   :  { %701 = vmatprep.subr.bf16.mxu1 %v814_v1 }
 0x12c   :  { %703 = vmatpush3.bf16.msra.mxu1 %v702_v17 }
 0x12d   :  { %704 = vmatprep.subr.bf16.mxu1 %v814_v1 }
 0x130   :  { %706 = vmatpush3.bf16.msra.mxu1 %v705_v20 }
 0x131   :  { %707 = vmatprep.subr.bf16.mxu1 %v814_v1 }
 0x134   :  { %709 = vmatpush3.bf16.msra.mxu1 %v708_v23 }
 0x135   :  { %710 = vmatprep.subr.bf16.mxu1 %v814_v1 }
 0x138   :  { %712 = vmatpush3.bf16.msra.mxu1 %v711_v26 }
 0x139   :  { %713 = vmatprep.subr.bf16.mxu1 %v814_v1 }
 0x13c   :  { %715 = vmatpush3.bf16.msra.mxu1 %v714_v29 }
 0x13d   :  { %716 = vmatprep.subr.bf16.mxu1 %v814_v1  ;;  %v456_v1 = vlaneseq }
 0x13f   :  { %v457_v43 = vand.u32 127, %v456_v1 }
 0x140   :  { %718 = vmatpush3.bf16.msra.mxu1 %v717_v32 }
 0x141   :  { %vm458_vm5 = vcmp.lt.s32.totalorder %v457_v43, 2 }
 0x1f6   :  { %v252_v6 = vpop.f32.mrb[0].mxu1 }
 0x1f7   :  { %v253_v7 = vadd.f32 %v479_v5, %v252_v6  ;;  %v576_v8 = vpop.f32.mrb[1].mxu1 }
 0x1f9   :  { %v257_v9 = vmul.f32 1.442695, %v253_v7  ;;  %vm256_vm3 = vcmp.gt.f32.partialorder %v253_v7, 0.0 }
 0x1fb   :  { %729 = vpow2.f32 %v257_v9 }
 0x205   :  { %v730_v10 = vpop.eup %729 }
 0x206   :  { %v480_v11 = vadd.f32 -1.0, %v730_v10 }
 0x208   :  { %v260_v12 = vmul.f32 1.6732632, %v480_v11 }
 0x20a   :  { %v261_v13 = vsel %vm256_vm3, %v253_v7, %v260_v12 }
 0x20b   :  { %v262_v14 = vmul.f32 1.050701, %v261_v13 }
 0x20d   :  { %610 = vmatmul.mubr.f32.vlgmr.msra.gmra.mrb[2].mxu0 %v262_v14 }
 0x2e0   :  { %v352_v34 = vpop.f32.mrb[2].mxu0 }
 0x2e1   :  { %v353_v35 = vadd.f32 %v481_v33, %v352_v34  ;;  %v611_v36 = vpop.f32.mrb[3].mxu0 }
 0x2e3   :  { %v357_v37 = vmul.f32 1.442695, %v353_v35  ;;  %vm356_vm4 = vcmp.gt.f32.partialorder %v353_v35, 0.0 }
 0x2e5   :  { %731 = vpow2.f32 %v357_v37 }
 0x2ef   :  { %v732_v38 = vpop.eup %731 }
 0x2f0   :  { %v482_v39 = vadd.f32 -1.0, %v732_v38 }
 0x2f2   :  { %v360_v40 = vmul.f32 1.6732632, %v482_v39 }
 0x2f4   :  { %v361_v41 = vsel %vm356_vm4, %v353_v35, %v360_v40 }
 0x2f5   :  { %v362_v42 = vmul.f32 1.050701, %v361_v41 }
 0x2f7   :  { %645 = vmatmul.mubr.f32.vlgmr.msra.gmra.mrb[2].mxu1 %v362_v42 }
 0x3ca   :  { %v452_v45 = vpop.f32.mrb[2].mxu1 }
 0x3cb   :  { %v453_v46 = vadd.f32 %v483_v44, %v452_v45  ;;  %v646_v47 = vpop.f32.mrb[3].mxu1 }
 0x3cd   :  { %v459_v48 = vsel %vm458_vm5, %v453_v46, -1e+30 }
 0x3ce   :  { %460 = vmax.xlane.f32.xlu0 %v459_v48 }
 0x45b   :  { %v461_v49 = vpop.xlane.xlu0 %460 }
 0x45c   :  { %v462_v50 = vsub.f32 %v459_v48, %v461_v49 }
 0x45e   :  { %v463_v51 = vmul.f32 1.442695, %v462_v50 }
 0x460   :  { %733 = vpow2.f32 %v463_v51 }
 0x46a   :  { %v734_v52 = vpop.eup %733 }
 0x46b   :  { %465 = vadd.xlane.f32.xlu0 %v734_v52 }
 0x4f8   :  { %v466_v53 = vpop.xlane.xlu0 %465 }
 0x4f9   :  { %735 = vrcp.f32 %v466_v53 }
 0x503   :  { %v736_v54 = vpop.eup %735 }
 0x504   :  { %v468_v55 = vmul.f32 %v736_v54, %v734_v52 }
 0x506   :  { %469 = vst [vmem:[%s980_s9] sm:$0xff] %v468_v55 }
 0x507   :  { %474 = vsyncpa [#allocation3], 1 }
 0x508   :  { %475 = vsyncpa [#allocation5], 1 }

</bundles_post_ra>
